<compile_context>
chip_gen: v6e
topology: v6e:2x2x1
jax: 0.10.0
libtpu: 0.0.40
codegen_flags: <defaults>
</compile_context>

<pallas_src>
import jax
import jax.numpy as jnp
from jax.experimental import pallas as pl
from jax.experimental.pallas import tpu as pltpu


def _round_up(x, m):
    return (x + m - 1) // m * m


# ----------------------------------------------------------------------------
# Fused Pallas kernel: encoder + mask-token mix + decoder 1x1 conv + masked L1
# ----------------------------------------------------------------------------
def _fused_kernel(patches_ref, mask_ref, w_ref, b_ref, tok_ref, num_ref):
    """Per row-tile:
        patches: (TM, pdim) bf16  patch pixels in (i, j, c) order (loss target too)
        mask:    (TM, 1)    bf16  per-patch 0/1 mask
        w:       (pdim, pdim) bf16  combined w_embed @ w_dec (PixelShuffle-permuted)
        b:       (1, pdim)  f32   b_embed @ w_dec + b_dec   (permuted)
        tok:     (1, pdim)  f32   mask_token @ w_dec + b_dec (permuted)
        num:     (1, 1, 128) f32  per-tile partial masked-L1 sum (scalar splat)
    """
    x_bf = patches_ref[...]                                # bf16 target / matmul input
    m = mask_ref[...].astype(jnp.float32)                  # (TM, 1)
    # Reconstruction for this tile (decoder output already in (i, j, c) pixel order).
    y = jnp.dot(x_bf, w_ref[...], preferred_element_type=jnp.float32) + b_ref[...]
    y = jnp.where(m > 0.0, tok_ref[...], y)                # mask-token rows
    # Masked L1 partial numerator.  Padded rows have mask == 0 -> contribute zero.
    num = jnp.sum(jnp.abs(x_bf.astype(jnp.float32) - y) * m)
    num_ref[...] = jnp.broadcast_to(num, num_ref.shape)    # lane-dense 128-wide store


# ----------------------------------------------------------------------------
# dmim module (synthetic encoder + conv1x1/PixelShuffle decoder + masked L1 loss)
# ----------------------------------------------------------------------------
class DmimPallas:
    def __init__(self, in_chans=3, patch_size=4, encoder_stride=4,
                 num_features=32, row_tile=2048, key=None):
        # Single patch-embed encoder => encoder_stride must equal patch_size, and
        # the decoder reconstructs 3 channels => in_chans must be 3.
        assert encoder_stride == patch_size
        assert in_chans == 3
        self.in_chans = in_chans
        self.patch_size = patch_size
        self.encoder_stride = encoder_stride
        self.num_features = num_features
        self.row_tile = row_tile

        if key is None:
            key = jax.random.PRNGKey(0)
        k_we, k_tok, k_dw, k_db = jax.random.split(key, 4)

        P = patch_size
        pdim = P * P * in_chans                 # patch-embed input features
        out_ch = encoder_stride ** 2 * 3        # decoder conv output channels (== pdim)

        # Synthetic (deterministic) encoder params: patch-embed conv as a matmul.
        # TODO(synk): the reference takes an arbitrary `encoder` nn.Module; a
        # synthetic patch-embed + mask-token encoder stands in for it here.
        self.w_embed = 0.02 * jax.random.normal(k_we, (pdim, num_features), jnp.float32)
        self.b_embed = jnp.zeros((1, num_features), jnp.float32)
        self.mask_token = 0.02 * jax.random.normal(k_tok, (1, num_features), jnp.float32)

        # Decoder params: Conv2d(num_features, r*r*3, kernel_size=1) in matmul form,
        # columns in PyTorch PixelShuffle channel order c*r*r + i*r + j.
        self.w_dec = 0.02 * jax.random.normal(k_dw, (num_features, out_ch), jnp.float32)
        self.b_dec = 0.01 * jax.random.normal(k_db, (1, out_ch), jnp.float32)

        # ---- Fold PixelShuffle + encoder + decoder into one set of fused params ----
        # Permute decoder output channels from PixelShuffle order (c, i, j) to the
        # patchified pixel order (i, j, c) so the decoder output lines up column-wise
        # with the patchified target (loss is a permutation-invariant sum).
        ii, jj, cc = jnp.meshgrid(jnp.arange(P), jnp.arange(P), jnp.arange(3),
                                  indexing="ij")
        perm = (cc * P * P + ii * P + jj).reshape(-1)        # (P*P*3,)
        w_dec_p = self.w_dec[:, perm]
        b_dec_p = self.b_dec[:, perm]

        self.pdim = pdim
        # No lane padding (K=N=48 stays 48): kernel is memory-bound, padding only
        # inflates the dominant HBM streams.
        self.w_comb = (self.w_embed @ w_dec_p).astype(jnp.bfloat16)        # (48, 48)
        self.b_comb = (self.b_embed @ w_dec_p + b_dec_p).astype(jnp.float32)   # (1, 48)
        self.tok_dec = (self.mask_token @ w_dec_p + b_dec_p).astype(jnp.float32)  # (1, 48)

    # ------------------------------------------------------------------ forward
    def forward(self, x_nchw, mask):
        """Matches dmim.forward: masked L1 reconstruction loss (scalar)."""
        B, C, H, W = x_nchw.shape
        P = self.patch_size
        Hp, Wp = H // P, W // P
        N = B * Hp * Wp

        # Patchify to (N, P*P*C) in (i, j, c) order, cast fused into the same pass
        # so the intermediate is bf16 (half the image bytes, no column pad).
        x_nhwc = jnp.transpose(x_nchw, (0, 2, 3, 1))
        patches = (x_nhwc.reshape(B, Hp, P, Wp, P, C)
                   .transpose(0, 1, 3, 2, 4, 5)
                   .reshape(N, self.pdim)).astype(jnp.bfloat16)
        mask_flat = mask.reshape(N, 1).astype(jnp.bfloat16)

        # Row tiling: TM multiple of 8; for small N shrink TM so the parallel row
        # grid keeps >= 2 steps (v7x megacore) instead of collapsing to 1.
        tm = self.row_tile
        if N < 2 * tm:
            tm = max(8, _round_up((N + 1) // 2, 8))
        npad = _round_up(N, tm)
        grid = npad // tm

        patches_pad = jnp.pad(patches, ((0, npad - N), (0, 0)))
        mask_pad = jnp.pad(mask_flat, ((0, npad - N), (0, 0)))

        num_parts = pl.pallas_call(
            _fused_kernel,
            grid=(grid,),
            in_specs=[
                pl.BlockSpec((tm, self.pdim), lambda i: (i, 0)),          # patches tile
                pl.BlockSpec((tm, 1), lambda i: (i, 0)),                  # mask tile
                pl.BlockSpec((self.pdim, self.pdim), lambda i: (0, 0)),   # W (resident)
                pl.BlockSpec((1, self.pdim), lambda i: (0, 0)),           # b (resident)
                pl.BlockSpec((1, self.pdim), lambda i: (0, 0)),           # tok (resident)
            ],
            out_specs=pl.BlockSpec((1, 1, 128), lambda i: (i, 0, 0)),
            out_shape=jax.ShapeDtypeStruct((grid, 1, 128), jnp.float32),
            compiler_params=pltpu.CompilerParams(
                dimension_semantics=("parallel",)),
        )(patches_pad, mask_pad, self.w_comb, self.b_comb, self.tok_dec)

        num = jnp.sum(num_parts[:, 0, 0])
        # den depends only on the mask -> tiny XLA reduce in the wrapper.
        den = jnp.sum(mask.astype(jnp.float32)) * float(P * P)
        return num / (den + 1e-5) / self.in_chans

    # --------------------------------------------------------- pure-JAX reference
    def reference_forward(self, x_nchw, mask):
        """Pure-JAX mirror of the fused kernel math (for correctness checking)."""
        B, C, H, W = x_nchw.shape
        P = self.patch_size
        Hp, Wp = H // P, W // P
        x_nhwc = jnp.transpose(x_nchw, (0, 2, 3, 1))
        patches = (x_nhwc.reshape(B, Hp, P, Wp, P, C)
                   .transpose(0, 1, 3, 2, 4, 5).reshape(-1, self.pdim))
        xb = patches.astype(jnp.bfloat16)
        x = xb.astype(jnp.float32)
        m = mask.reshape(-1, 1).astype(jnp.float32)
        y = jnp.dot(xb, self.w_comb, preferred_element_type=jnp.float32) + self.b_comb
        y = jnp.where(m > 0.0, self.tok_dec, y)
        num = jnp.sum(jnp.abs(x - y) * m)
        den = jnp.sum(m) * float(P * P)
        return num / (den + 1e-5) / self.in_chans


if __name__ == "__main__":
    key = jax.random.PRNGKey(0)
    k_x, k_m, k_p = jax.random.split(key, 3)

    B, C, H, W = 2, 3, 16, 16
    patch_size = encoder_stride = 4
    num_features = 32
    Hp, Wp = H // patch_size, W // patch_size

    x = jax.random.normal(k_x, (B, C, H, W), jnp.float32)            # NCHW, like PyTorch
    mask = (jax.random.uniform(k_m, (B, Hp, Wp)) > 0.5).astype(jnp.float32)

    model = DmimPallas(in_chans=C, patch_size=patch_size,
                       encoder_stride=encoder_stride,
                       num_features=num_features, key=k_p)

    loss = jax.jit(model.forward)(x, mask)
    jax.block_until_ready(loss)

    ref = model.reference_forward(x, mask)
    assert loss.shape == () and bool(jnp.isfinite(loss))
    assert abs(float(loss) - float(ref)) <= 2e-2 * max(1e-6, abs(float(ref))) + 1e-5
    print("KERNEL_OK")
</pallas_src>

<mosaic_0001>
module attributes {stable_mosaic.version = 11 : i64} {
  func.func @_fused_kernel(%arg0: i32, %arg1: memref<16x48xbf16, #tpu.memory_space<vmem>>, %arg2: memref<16x1xbf16, #tpu.memory_space<vmem>>, %arg3: memref<48x48xbf16, #tpu.memory_space<vmem>>, %arg4: memref<1x48xf32, #tpu.memory_space<vmem>>, %arg5: memref<1x48xf32, #tpu.memory_space<vmem>>, %arg6: memref<1x1x128xf32, #tpu.memory_space<vmem>>) attributes {dimension_semantics = [#tpu.dimension_semantics<parallel>], iteration_bounds = array<i64: 2>, scalar_prefetch = 0 : i64, scratch_operands = 0 : i64, tpu.core_type = #tpu.core_type<tc>, window_params = [{transform_indices = @transform_0, window_bounds = array<i64: 16, 48>}, {transform_indices = @transform_1, window_bounds = array<i64: 16, 1>}, {pipeline_mode = #tpu.pipeline_mode<synchronous>, transform_indices = @transform_2, window_bounds = array<i64: 48, 48>}, {pipeline_mode = #tpu.pipeline_mode<synchronous>, transform_indices = @transform_3, window_bounds = array<i64: 1, 48>}, {pipeline_mode = #tpu.pipeline_mode<synchronous>, transform_indices = @transform_4, window_bounds = array<i64: 1, 48>}, {transform_indices = @transform_5, window_bounds = array<i64: 1, 1, 128>}]} {
    %c0 = arith.constant 0 : index
    %c0_0 = arith.constant 0 : index
    %0 = vector.load %arg1[%c0, %c0_0] : memref<16x48xbf16, #tpu.memory_space<vmem>>, vector<16x48xbf16>
    %c0_1 = arith.constant 0 : index
    %c0_2 = arith.constant 0 : index
    %1 = vector.load %arg2[%c0_1, %c0_2] : memref<16x1xbf16, #tpu.memory_space<vmem>>, vector<16x1xbf16>
    %2 = arith.extf %1 : vector<16x1xbf16> to vector<16x1xf32>
    %c0_3 = arith.constant 0 : index
    %c0_4 = arith.constant 0 : index
    %3 = vector.load %arg3[%c0_3, %c0_4] : memref<48x48xbf16, #tpu.memory_space<vmem>>, vector<48x48xbf16>
    %cst = arith.constant dense<0.000000e+00> : vector<16x48xf32>
    %4 = tpu.matmul %0, %3, %cst {dimension_numbers = #tpu.dot_dimension_numbers<[1], [0], [0], [1], [0, 0, 1, 1], [], []>} : vector<16x48xbf16>, vector<48x48xbf16>, vector<16x48xf32> -> vector<16x48xf32>
    %c0_5 = arith.constant 0 : index
    %c0_6 = arith.constant 0 : index
    %5 = vector.load %arg4[%c0_5, %c0_6] : memref<1x48xf32, #tpu.memory_space<vmem>>, vector<1x48xf32>
    %6 = vector.broadcast %5 : vector<1x48xf32> to vector<16x48xf32>
    %7 = arith.addf %4, %6 : vector<16x48xf32>
    %cst_7 = arith.constant 0.000000e+00 : f32
    %8 = vector.broadcast %cst_7 : f32 to vector<16x1xf32>
    %9 = arith.cmpf ogt, %2, %8 : vector<16x1xf32>
    %c0_8 = arith.constant 0 : index
    %c0_9 = arith.constant 0 : index
    %10 = vector.load %arg5[%c0_8, %c0_9] : memref<1x48xf32, #tpu.memory_space<vmem>>, vector<1x48xf32>
    %11 = vector.shape_cast %9 : vector<16x1xi1> to vector<16x1xi1>
    %12 = vector.broadcast %11 : vector<16x1xi1> to vector<16x48xi1>
    %13 = vector.shape_cast %10 : vector<1x48xf32> to vector<1x48xf32>
    %14 = vector.broadcast %13 : vector<1x48xf32> to vector<16x48xf32>
    %15 = arith.select %12, %14, %7 : vector<16x48xi1>, vector<16x48xf32>
    %16 = arith.extf %0 : vector<16x48xbf16> to vector<16x48xf32>
    %17 = arith.subf %16, %15 : vector<16x48xf32>
    %18 = math.absf %17 : vector<16x48xf32>
    %19 = vector.broadcast %2 : vector<16x1xf32> to vector<16x48xf32>
    %20 = arith.mulf %18, %19 : vector<16x48xf32>
    %21 = vector.shape_cast %20 : vector<16x48xf32> to vector<1x16x48xf32>
    %cst_10 = arith.constant dense<0.000000e+00> : vector<1xf32>
    %22 = vector.multi_reduction <add>, %21, %cst_10 [1, 2] : vector<1x16x48xf32> to vector<1xf32>
    %23 = vector.shape_cast %22 : vector<1xf32> to vector<1x1x1xf32>
    %24 = vector.extract %23[0, 0, 0] : f32 from vector<1x1x1xf32>
    %25 = vector.broadcast %24 : f32 to vector<1x1x128xf32>
    %c0_11 = arith.constant 0 : index
    %c0_12 = arith.constant 0 : index
    %c0_13 = arith.constant 0 : index
    %26 = vector.load %arg6[%c0_11, %c0_12, %c0_13] : memref<1x1x128xf32, #tpu.memory_space<vmem>>, vector<1x1x128xf32>
    tpu.vector_store %arg6[%c0_11, %c0_12, %c0_13], %25 {strides = array<i32>} : memref<1x1x128xf32, #tpu.memory_space<vmem>>, vector<1x1x128xf32>,
    return
  }
  func.func @transform_0(%arg0: i32) -> (i32, i32) {
    %c0_i32 = arith.constant 0 : i32
    %c0_i32_0 = arith.constant 0 : i32
    return %arg0, %c0_i32 : i32, i32
  }
  func.func @transform_1(%arg0: i32) -> (i32, i32) {
    %c0_i32 = arith.constant 0 : i32
    %c0_i32_0 = arith.constant 0 : i32
    return %arg0, %c0_i32 : i32, i32
  }
  func.func @transform_2(%arg0: i32) -> (i32, i32) {
    %c0_i32 = arith.constant 0 : i32
    %c0_i32_0 = arith.constant 0 : i32
    %c0_i32_1 = arith.constant 0 : i32
    return %c0_i32, %c0_i32_0 : i32, i32
  }
  func.func @transform_3(%arg0: i32) -> (i32, i32) {
    %c0_i32 = arith.constant 0 : i32
    %c0_i32_0 = arith.constant 0 : i32
    %c0_i32_1 = arith.constant 0 : i32
    return %c0_i32, %c0_i32_0 : i32, i32
  }
  func.func @transform_4(%arg0: i32) -> (i32, i32) {
    %c0_i32 = arith.constant 0 : i32
    %c0_i32_0 = arith.constant 0 : i32
    %c0_i32_1 = arith.constant 0 : i32
    return %c0_i32, %c0_i32_0 : i32, i32
  }
  func.func @transform_5(%arg0: i32) -> (i32, i32, i32) {
    %c0_i32 = arith.constant 0 : i32
    %c0_i32_0 = arith.constant 0 : i32
    %c0_i32_1 = arith.constant 0 : i32
    return %arg0, %c0_i32, %c0_i32_0 : i32, i32, i32
  }
}

</mosaic_0001>

<bundles_post_ra>
// kernel: forward.1
= control target key start
LH: loop header
LB: loop body
LE: loop exit
PB: predicated region body
PF: predicated region fallthrough
CT: control target
= control target key end

     0   :  { %s547_s18 = smov 0   ;;  %s590_s0 = inlined_call_operand.vmem [shape: bf16[32,48], index: 0, kind: input, shape index: {}]   ;;  %s591_s1 = inlined_call_operand.vmem [shape: bf16[32,1], index: 1, kind: input, shape index: {}]   ;;  %s592_s2 = inlined_call_operand.vmem [shape: bf16[48,48], index: 2, kind: input, shape index: {}]   ;;  %s593_s3 = inlined_call_operand.vmem [shape: f32[1,48], index: 3, kind: input, shape index: {}]   ;;  %s594_s4 = inlined_call_operand.vmem [shape: f32[1,48], index: 4, kind: input, shape index: {}]   ;;  %s595_s5 = inlined_call_operand.vmem [shape: f32[2,1,128], index: 5, kind: output, shape index: {}]  }
   0x1 LB: > { %s553_s19 = sadd.s32 4294967295, %s512_s18   ;;  %p449_p0 = scmp.ge.s32.totalorder %s512_s18, 1  ;;  %s512_s18 = sphi %s547_s18, %s15_s18  }
   0x2   : > { %p199_p1 = scmp.lt.s32.totalorder %s512_s18, 3 }
   0x4   : > { %p200_p2 = pnand %p449_p0, %p199_p1 }
   0x5   : > { %s450_s24 = sshll.u32 (!%p200_p2), %s553_s19, 1  ;;  %p242_p4 = scmp.lt.s32.totalorder (!%p200_p2), %s553_s19, 1 }
   0x6   : > { %203 = sbr.rel (%p200_p2) target bundleno = 435 (0x1b3), region = 40  ;;  %p231_p3 = scmp.lt.s32.totalorder (!%p200_p2), %s450_s24, 3 }
   0xb   : > { %v501_v0 = vld [vmem:[%s592_s2 + $0x10] sm:$0xff]   ;;  %v514_v1 = vmov 0.0   ;;  %v502_v2 = vld [vmem:[%s592_s2 + $0x8] sm:$0xff]   ;;  %vm515_vm0 = vmmov 0   ;;  %v516_v3 = vmov 0   ;;  %s597_s24 = smov (!%p231_p3, %s450_s24), 3 }
   0xc   : > { %471 = vmatprep.subr.bf16.mxu0 %v514_v1  ;;  %477 = vmatprep.mubr.msk.bf16.mxu0 %vm515_vm0, %v514_v1  ;;  %v503_v4 = vld [vmem:[%s592_s2] sm:$0xff]   ;;  %s451_s27 = sshll.u32 %s597_s24, 2  ;;  %vm288_vm1 = vcmask 392192   ;;  %s599_s19 = smov (!%p242_p4, %s553_s19), 1 }
   0xd   : > { %472 = vmatpush3.bf16.msra.mxu0 %v501_v0  ;;  %494 = vset.pattern.permute.xlu0 %v516_v3  ;;  %s234_s30 = scalar_lea.vmem %s590_s0, %s451_s27  ;;  %s240_s8 = scalar_lea.vmem %s591_s1, %s451_s27  ;;  %v454_v13 = vld [vmem:[%s593_s3] ss:$0 sm:$0xff] }
   0xe   : > { %473 = vmatprep.subr.bf16.mxu0 %v514_v1  ;;  %495 = vset.pattern.permute.xlu1 %v516_v3  ;;  %v246_v5 = vld [vmem:[%s234_s30] sm:$0xff]   ;;  %s244_s15 = scalar_lea.vmem %s595_s5, %s599_s19 }
   0xf   : > { %v464_v6 = vld [vmem:[%s240_s8] sm:$0xff]   ;;  %v354_v16 = vunpack.c.l.bf16 %v246_v5  ;;  %v355_v24 = vunpack.c.h.bf16 %v246_v5 }
  0x10   : > { %v465_v7 = vunpack.c.l.bf16 %v464_v6  ;;  %v466_v8 = vunpack.c.h.bf16 %v464_v6  ;;  %v460_v15 = vld [vmem:[%s594_s4] ss:$0 sm:$0xff] }
  0x11   : > { %474 = vmatpush3.bf16.msra.mxu0 %v502_v2 }
  0x12   : > { %475 = vmatprep.subr.bf16.mxu0 %v514_v1  ;;  %vm333_vm2 = vcmp.gt.f32.partialorder %v465_v7, 0.0  ;;  %vm334_vm3 = vcmp.gt.f32.partialorder %v466_v8, 0.0  ;;  %v496_v9 = vpack.i.bf16 %v466_v8, %v465_v7 }
  0x13   : > { %v336_v10 = vsel %vm333_vm2, 1, %v516_v3  ;;  %v337_v11 = vsel %vm334_vm3, 1, %v516_v3 }
  0x14   : > { %339 = vperm.xlu0 %494, %v336_v10   ;;  %497 = vperm.xlu1 %495, %v496_v9  }
  0x15   : > { %476 = vmatpush3.bf16.msra.mxu0 %v503_v4 }
  0x18   : > { %478 = vmatmul.mubr.msk.bf16.vlgmr.msra.gmra.mxu0 %vm288_vm1, %v246_v5  ;;  %342 = vperm.xlu0 %494, %v337_v11  }
  0x8f   : > { %v340_v12 = vpop.permute.xlu0 %339  ;;  %v498_v21 = vpop.permute.xlu1 %497 }
  0x90   : > { %vm344_vm4 = vcmp.eq.s32.totalorder %v340_v12, 1  ;;  %v499_v26 = vunpack.i.l.bf16 %v498_v21  ;;  %v500_v31 = vunpack.i.h.bf16 %v498_v21 }
  0x93   : > { %v343_v20 = vpop.permute.xlu0 %342 }
  0x94   : > { %vm345_vm5 = vcmp.eq.s32.totalorder %v343_v20, 1 }
  0xd8   : > { %v326_v14 = vpop.f32.mrf.mxu0 }
  0xd9   : > { %v327_v17 = vadd.f32 %v454_v13, %v326_v14 }
  0xda   : > { %v479_v18 = vpop.f32.mrf.mxu0 }
  0xdb   : > { %v352_v19 = vsel %vm344_vm4, %v460_v15, %v327_v17 }
  0xdc   : > { %v356_v22 = vsub.f32 %v354_v16, %v352_v19  ;;  %v329_v23 = vpop.f32.mrf.mxu0 }
  0xdd   : > { %v330_v25 = vadd.f32 %v454_v13, %v329_v23 }
  0xde   : > { %v358_v27 = vand.u32 2147483647, %v356_v22  ;;  %v480_v28 = vpop.f32.mrf.mxu0 }
  0xdf   : > { %v353_v29 = vsel %vm345_vm5, %v460_v15, %v330_v25 }
  0xe0   : > { %v357_v30 = vsub.f32 %v355_v24, %v353_v29  ;;  %v370_v33 = vmul.f32 %v499_v26, %v358_v27 }
  0xe2   : > { %v359_v32 = vand.u32 2147483647, %v357_v30  ;;  %v372_v35 = vsel %vm288_vm1, %v370_v33, 0.0 }
  0xe4   : > { %v371_v34 = vmul.f32 %v500_v31, %v359_v32 }
  0xe6   : > { %v373_v36 = vsel %vm288_vm1, %v371_v34, 0.0 }
  0xe7   : > { %v374_v37 = vadd.f32 %v373_v36, %v372_v35 }
  0xe9   : > { %375 = vadd.xlane.f32.xlu1 %v374_v37 }
 0x172   : > { %v376_v38 = vpop.xlane.xlu1 %375 }
 0x173   : > { %v377_v39 = vrot.slane %v376_v38, 4 }
 0x175   : > { %v378_v40 = vadd.f32 %v377_v39, %v376_v38 }
 0x177   : > { %v379_v41 = vrot.slane %v378_v40, 2 }
 0x179   : > { %v380_v42 = vadd.f32 %v379_v41, %v378_v40 }
 0x17b   : > { %v381_v43 = vrot.slane %v380_v42, 1 }
 0x17d   : > { %v382_v44 = vadd.f32 %v381_v43, %v380_v42 }
 0x17f   : > { %481 = vpush %v382_v44 }
 0x1b0   : > { %s482_s16 = spop %481 }
 0x1b1   : > { %v384_v45 = vstv %s482_s16 }
 0x1b2   : > { %385 = vst [vmem:[%s244_s15] sm:$0x1] %v384_v45 }
 0x1b3 PF: > { %s15_s18 = sadd.s32 1, %s512_s18  }
 0x1b4   : > { %p12_p5 = scmp.ge.s32.totalorder %s15_s18, 4  }
 0x1b6   :  { %14 = sbr.rel (!%p12_p5) target bundleno = 1 (0x1), region = 73 }

</bundles_post_ra>
